<compile_context>
chip_gen: v6e
topology: v6e:2x2x1
jax: 0.10.0
libtpu: 0.0.40
codegen_flags: <defaults>
</compile_context>

<pallas_src>
import jax
import jax.numpy as jnp
from jax.experimental import pallas as pl
from jax.experimental.pallas import tpu as pltpu


_LANE = 128
_KTILE_WEIGHT_BYTES = 20 * 1024 * 1024   # stream weights over K past this (v7x VMEM)


def _round_up(x, m):
    return (x + m - 1) // m * m


def _pick_batch_tile(b_padded):
    """Largest 8-aligned tile in {8..512} dividing the (padded) batch,
    preferring >=2 grid steps so v7x's second TensorCore gets work."""
    candidates = [tb for tb in (512, 256, 128, 64, 32, 16, 8) if b_padded % tb == 0]
    if not candidates:
        return b_padded
    multi = [tb for tb in candidates if b_padded // tb >= 2]
    return multi[0] if multi else candidates[0]


def _pick_k_tile(d):
    for tk in (1024, 512, 256, 128):
        if d % tk == 0:
            return tk
    return None


# ----------------------------------------------------------------------------
# Kernels
# ----------------------------------------------------------------------------
def _encoder_kernel(x_ref, w_ref, b_ref, mu_ref, logvar_ref):
    """Fused dual projection: y = x @ [W1.T | W2.T] + [b1 | b2].

    x_ref      : (TB, D)     bf16 batch tile
    w_ref      : (D, 2*Lp)   bf16 fused weights, resident (single-buffered)
    b_ref      : (1, 2*Lp)   f32 fused bias, resident
    mu_ref     : (TB, Lp)    f32
    logvar_ref : (TB, Lp)    f32
    """
    lp = mu_ref.shape[-1]
    y = jnp.dot(x_ref[...], w_ref[...], preferred_element_type=jnp.float32)
    y = y + b_ref[...]
    mu_ref[...] = y[:, :lp].astype(mu_ref.dtype)
    logvar_ref[...] = y[:, lp:].astype(logvar_ref.dtype)


def _encoder_kernel_ktiled(x_ref, w_ref, b_ref, mu_ref, logvar_ref, acc_ref):
    """Same math with the contraction (D) streamed over grid axis 1."""
    k = pl.program_id(1)

    @pl.when(k == 0)
    def _():
        # Seed the accumulator with the bias: removes a per-iteration VPU add.
        acc_ref[...] = jnp.broadcast_to(b_ref[...], acc_ref.shape)

    acc_ref[...] += jnp.dot(x_ref[...], w_ref[...],
                            preferred_element_type=jnp.float32)

    @pl.when(k == pl.num_programs(1) - 1)
    def _():
        lp = mu_ref.shape[-1]
        y = acc_ref[...]
        mu_ref[...] = y[:, :lp].astype(mu_ref.dtype)
        logvar_ref[...] = y[:, lp:].astype(logvar_ref.dtype)


# ----------------------------------------------------------------------------
# Wrapper
# ----------------------------------------------------------------------------
def prepare_encoder_params(w1, b1, w2, b2, *, compute_dtype=jnp.bfloat16):
    """One-time parameter prep (call OUTSIDE the hot training/inference step).

    Fuses the two PyTorch-layout (L, D) Linear weights into a single
    pre-transposed (D, 2*Lp) slab, pads the latent dim to a multiple of 128
    (lane-dense stores) and casts to the bf16 MXU operand dtype. Bias stays
    f32 and is added after the f32 accumulate.
    """
    latent_dim, data_dim = w1.shape
    assert w2.shape == (latent_dim, data_dim)
    lp = _round_up(latent_dim, _LANE)

    w_cat = jnp.zeros((data_dim, 2 * lp), compute_dtype)
    w_cat = w_cat.at[:, :latent_dim].set(w1.T.astype(compute_dtype))
    w_cat = w_cat.at[:, lp:lp + latent_dim].set(w2.T.astype(compute_dtype))

    b_cat = jnp.zeros((1, 2 * lp), jnp.float32)
    b_cat = b_cat.at[0, :latent_dim].set(b1.astype(jnp.float32))
    b_cat = b_cat.at[0, lp:lp + latent_dim].set(b2.astype(jnp.float32))

    return dict(w_cat=w_cat, b_cat=b_cat,
                latent_dim=latent_dim, latent_pad=lp, data_dim=data_dim)


def encoder_forward(x, params, *, batch_tile=None):
    """x: (B, data_dim). Returns (muz, logvarz), each (B, latent_dim), f32."""
    w_cat, b_cat = params["w_cat"], params["b_cat"]
    latent_dim = params["latent_dim"]
    lp = params["latent_pad"]
    data_dim = params["data_dim"]
    b, d = x.shape
    assert d == data_dim

    # bf16 MXU operands (f32 accumulation stays inside the kernel). In a real
    # model the upstream activation would already be bf16 -> this is a no-op.
    x = x.astype(w_cat.dtype)

    # Pad batch to a sublane multiple; tiles large enough to amortize per-step
    # overhead and (when B allows) at least 2 grid steps for v7x dual-TC.
    bp = _round_up(b, 8)
    if bp != b:
        x = jnp.pad(x, ((0, bp - b), (0, 0)))
    tb = batch_tile if batch_tile is not None else _pick_batch_tile(bp)
    assert bp % tb == 0, "padded batch must be divisible by the batch tile"

    wcat_bytes = w_cat.size * w_cat.dtype.itemsize
    out_shape = (jax.ShapeDtypeStruct((bp, lp), jnp.float32),
                 jax.ShapeDtypeStruct((bp, lp), jnp.float32))
    cost = pl.CostEstimate(
        flops=2 * bp * data_dim * 2 * lp,
        transcendentals=0,
        bytes_accessed=(x.size * x.dtype.itemsize + wcat_bytes
                        + b_cat.size * 4 + 2 * bp * lp * 4),
    )

    ktile = _pick_k_tile(data_dim) if wcat_bytes > _KTILE_WEIGHT_BYTES else None

    if ktile is None:
        # Whole fused weight slab resident in VMEM (single-buffered).
        est_vmem = (wcat_bytes + b_cat.size * 4
                    + 2 * tb * data_dim * x.dtype.itemsize
                    + 2 * 2 * tb * lp * 4)
        cp = dict(dimension_semantics=("parallel",))
        if est_vmem > 12 * 1024 * 1024:
            cp["vmem_limit_bytes"] = min(int(est_vmem * 1.3), 48 * 1024 * 1024)
        mu_p, logvar_p = pl.pallas_call(
            _encoder_kernel,
            out_shape=out_shape,
            grid=(bp // tb,),
            in_specs=[
                pl.BlockSpec((tb, data_dim), lambda i: (i, 0)),
                pl.BlockSpec((data_dim, 2 * lp), lambda i: (0, 0),
                             pipeline_mode=pl.Buffered(1)),
                pl.BlockSpec((1, 2 * lp), lambda i: (0, 0),
                             pipeline_mode=pl.Buffered(1)),
            ],
            out_specs=(pl.BlockSpec((tb, lp), lambda i: (i, 0)),
                       pl.BlockSpec((tb, lp), lambda i: (i, 0))),
            compiler_params=pltpu.CompilerParams(**cp),
            cost_estimate=cost,
        )(x, w_cat, b_cat)
    else:
        # Weights too large to sit resident (v7x 64 MiB VMEM): stream over K
        # with a bias-seeded f32 accumulator, write back on the last K step.
        nk = data_dim // ktile
        est_vmem = (2 * ktile * 2 * lp * w_cat.dtype.itemsize
                    + b_cat.size * 4
                    + 2 * tb * ktile * x.dtype.itemsize
                    + tb * 2 * lp * 4
                    + 2 * 2 * tb * lp * 4)
        cp = dict(dimension_semantics=("parallel", "arbitrary"))
        if est_vmem > 12 * 1024 * 1024:
            cp["vmem_limit_bytes"] = min(int(est_vmem * 1.3), 48 * 1024 * 1024)
        mu_p, logvar_p = pl.pallas_call(
            _encoder_kernel_ktiled,
            out_shape=out_shape,
            grid=(bp // tb, nk),
            in_specs=[
                pl.BlockSpec((tb, ktile), lambda i, k: (i, k)),
                pl.BlockSpec((ktile, 2 * lp), lambda i, k: (k, 0)),
                pl.BlockSpec((1, 2 * lp), lambda i, k: (0, 0),
                             pipeline_mode=pl.Buffered(1)),
            ],
            out_specs=(pl.BlockSpec((tb, lp), lambda i, k: (i, 0)),
                       pl.BlockSpec((tb, lp), lambda i, k: (i, 0))),
            scratch_shapes=[pltpu.VMEM((tb, 2 * lp), jnp.float32)],
            compiler_params=pltpu.CompilerParams(**cp),
            cost_estimate=cost,
        )(x, w_cat, b_cat)

    # Only slice if padding was actually applied (no-op copy at production
    # shapes where B % 8 == 0 and latent_dim % 128 == 0).
    if bp != b or lp != latent_dim:
        muz = mu_p[:b, :latent_dim]
        logvarz = logvar_p[:b, :latent_dim]
    else:
        muz, logvarz = mu_p, logvar_p
    return muz, logvarz


# ----------------------------------------------------------------------------
# Self-test
# ----------------------------------------------------------------------------
if __name__ == "__main__":
    B, D, L = 8, 32, 16          # batch=8, data_dim=32, latent_dim=16
    key = jax.random.PRNGKey(0)
    kx, k1, k2, k3, k4 = jax.random.split(key, 5)
    bound = 1.0 / jnp.sqrt(jnp.float32(D))
    x = jax.random.normal(kx, (B, D), jnp.float32)
    w1 = jax.random.uniform(k1, (L, D), jnp.float32, -bound, bound)
    b1 = jax.random.uniform(k2, (L,), jnp.float32, -bound, bound)
    w2 = jax.random.uniform(k3, (L, D), jnp.float32, -bound, bound)
    b2 = jax.random.uniform(k4, (L,), jnp.float32, -bound, bound)

    # One-time parameter prep (outside the hot path).
    params = prepare_encoder_params(w1, b1, w2, b2)

    muz, logvarz = encoder_forward(x, params)
    muz, logvarz = jax.block_until_ready((muz, logvarz))

    # f32 reference (PyTorch semantics); bf16 MXU operands -> loose tolerance.
    muz_ref = x @ w1.T + b1
    logvarz_ref = x @ w2.T + b2
    assert muz.shape == (B, L), muz.shape
    assert logvarz.shape == (B, L), logvarz.shape
    assert jnp.allclose(muz, muz_ref, atol=2e-2, rtol=2e-2), \
        float(jnp.max(jnp.abs(muz - muz_ref)))
    assert jnp.allclose(logvarz, logvarz_ref, atol=2e-2, rtol=2e-2), \
        float(jnp.max(jnp.abs(logvarz - logvarz_ref)))
    print("KERNEL_OK")
</pallas_src>

<mosaic_0001>
module attributes {stable_mosaic.version = 11 : i64} {
  func.func @_encoder_kernel(%arg0: i32, %arg1: memref<8x32xbf16, #tpu.memory_space<vmem>>, %arg2: memref<32x256xbf16, #tpu.memory_space<vmem>>, %arg3: memref<1x256xf32, #tpu.memory_space<vmem>>, %arg4: memref<8x128xf32, #tpu.memory_space<vmem>>, %arg5: memref<8x128xf32, #tpu.memory_space<vmem>>) attributes {dimension_semantics = [#tpu.dimension_semantics<parallel>], iteration_bounds = array<i64: 1>, scalar_prefetch = 0 : i64, scratch_operands = 0 : i64, tpu.core_type = #tpu.core_type<tc>, window_params = [{transform_indices = @transform_0, window_bounds = array<i64: 8, 32>}, {pipeline_mode = #tpu.pipeline_mode<synchronous>, transform_indices = @transform_1, window_bounds = array<i64: 32, 256>}, {pipeline_mode = #tpu.pipeline_mode<synchronous>, transform_indices = @transform_2, window_bounds = array<i64: 1, 256>}, {transform_indices = @transform_3, window_bounds = array<i64: 8, 128>}, {transform_indices = @transform_4, window_bounds = array<i64: 8, 128>}]} {
    %c0 = arith.constant 0 : index
    %c0_0 = arith.constant 0 : index
    %0 = vector.load %arg1[%c0, %c0_0] : memref<8x32xbf16, #tpu.memory_space<vmem>>, vector<8x32xbf16>
    %c0_1 = arith.constant 0 : index
    %c0_2 = arith.constant 0 : index
    %1 = vector.load %arg2[%c0_1, %c0_2] : memref<32x256xbf16, #tpu.memory_space<vmem>>, vector<32x256xbf16>
    %cst = arith.constant dense<0.000000e+00> : vector<8x256xf32>
    %2 = tpu.matmul %0, %1, %cst {dimension_numbers = #tpu.dot_dimension_numbers<[1], [0], [0], [1], [0, 0, 1, 1], [], []>} : vector<8x32xbf16>, vector<32x256xbf16>, vector<8x256xf32> -> vector<8x256xf32>
    %c0_3 = arith.constant 0 : index
    %c0_4 = arith.constant 0 : index
    %3 = vector.load %arg3[%c0_3, %c0_4] : memref<1x256xf32, #tpu.memory_space<vmem>>, vector<1x256xf32>
    %4 = vector.broadcast %3 : vector<1x256xf32> to vector<8x256xf32>
    %5 = arith.addf %2, %4 : vector<8x256xf32>
    %6 = vector.extract_strided_slice %5 {offsets = [0, 0], sizes = [8, 128], strides = [1, 1]} : vector<8x256xf32> to vector<8x128xf32>
    %c0_5 = arith.constant 0 : index
    %c0_6 = arith.constant 0 : index
    %7 = vector.load %arg4[%c0_5, %c0_6] : memref<8x128xf32, #tpu.memory_space<vmem>>, vector<8x128xf32>
    tpu.vector_store %arg4[%c0_5, %c0_6], %6 {strides = array<i32>} : memref<8x128xf32, #tpu.memory_space<vmem>>, vector<8x128xf32>,
    %8 = vector.extract_strided_slice %5 {offsets = [0, 128], sizes = [8, 128], strides = [1, 1]} : vector<8x256xf32> to vector<8x128xf32>
    %c0_7 = arith.constant 0 : index
    %c0_8 = arith.constant 0 : index
    %9 = vector.load %arg5[%c0_7, %c0_8] : memref<8x128xf32, #tpu.memory_space<vmem>>, vector<8x128xf32>
    tpu.vector_store %arg5[%c0_7, %c0_8], %8 {strides = array<i32>} : memref<8x128xf32, #tpu.memory_space<vmem>>, vector<8x128xf32>,
    return
  }
  func.func @transform_0(%arg0: i32) -> (i32, i32) {
    %c0_i32 = arith.constant 0 : i32
    %c0_i32_0 = arith.constant 0 : i32
    return %arg0, %c0_i32 : i32, i32
  }
  func.func @transform_1(%arg0: i32) -> (i32, i32) {
    %c0_i32 = arith.constant 0 : i32
    %c0_i32_0 = arith.constant 0 : i32
    %c0_i32_1 = arith.constant 0 : i32
    return %c0_i32, %c0_i32_0 : i32, i32
  }
  func.func @transform_2(%arg0: i32) -> (i32, i32) {
    %c0_i32 = arith.constant 0 : i32
    %c0_i32_0 = arith.constant 0 : i32
    %c0_i32_1 = arith.constant 0 : i32
    return %c0_i32, %c0_i32_0 : i32, i32
  }
  func.func @transform_3(%arg0: i32) -> (i32, i32) {
    %c0_i32 = arith.constant 0 : i32
    %c0_i32_0 = arith.constant 0 : i32
    return %arg0, %c0_i32 : i32, i32
  }
  func.func @transform_4(%arg0: i32) -> (i32, i32) {
    %c0_i32 = arith.constant 0 : i32
    %c0_i32_0 = arith.constant 0 : i32
    return %arg0, %c0_i32 : i32, i32
  }
}

</mosaic_0001>

<bundles_post_ra>
// kernel: tpu_custom_call.1
= control target key start
LH: loop header
LB: loop body
LE: loop exit
PB: predicated region body
PF: predicated region fallthrough
CT: control target
= control target key end

     0   :  { %10 = vsyncpa [#allocation3], 0  ;;  %s312_s0 = inlined_call_operand.hbm [shape: bf16[8,32], index: 0, kind: input, shape index: {}]   ;;  %s313_s1 = inlined_call_operand.hbm [shape: bf16[32,256], index: 1, kind: input, shape index: {}]   ;;  %s314_s2 = inlined_call_operand.vmem [shape: f32[1,256], index: 2, kind: input, shape index: {}]   ;;  %s315_s3 = inlined_call_operand.hbm [shape: f32[8,128], index: 3, kind: output, shape index: {0}]   ;;  %s316_s4 = inlined_call_operand.hbm [shape: f32[8,128], index: 4, kind: output, shape index: {1}]  }
   0x1   :  { %11 = vsyncpa [#allocation6], 0 }
   0x2   :  { %12 = vsyncpa [#allocation4], 0 }
   0x3   :  { %13 = vsyncpa [#allocation9], 0  ;;  %s265_s15 = smov [#allocation2]   ;;  %s266_s17 = smov [#allocation5]  }
   0x4   :  { %s20_s16 = sshll.u32 %s265_s15, 4  ;;  %s29_s18 = sshll.u32 %s266_s17, 4  ;;  %s21_s16 = int_to_ptr.vmem [resolvable:$true] %s20_s16  ;;  %s30_s18 = int_to_ptr.vmem [resolvable:$true] %s29_s18 }
   0x5   :  { %s185_s19 = scalar_lea.vmem %s21_s16, 64  ;;  %p190_p1 = scmp.lt.s32.totalorder %s21_s16, %s21_s16 }
   0x6   :  { %p186_p0 = scmp.ne.s32.totalorder %s21_s16, %s185_s19  ;;  %p191_p2 = scmp.lt.s32.totalorder %s185_s19, %s185_s19 }
   0x8   :  { %p192_p3 = por %p191_p2, %p190_p1 }
   0xa   :  { %p193_p4 = pnand %p192_p3, %p186_p0 }
   0xc   :  { %196 = shalt.err (!%p193_p4)
}
   0xd   :  { %23 = dma.hbm_to_vmem [thread:$0]  %s312_s0, 64, %s21_s16, [#allocation3]  }
   0xe   :  { %s205_s22 = scalar_lea.vmem %s30_s18, 512  ;;  %p210_p6 = scmp.lt.s32.totalorder %s30_s18, %s30_s18 }
   0xf   :  { %p206_p5 = scmp.ne.s32.totalorder %s30_s18, %s205_s22  ;;  %p211_p7 = scmp.lt.s32.totalorder %s205_s22, %s205_s22 }
  0x11   :  { %p212_p8 = por %p211_p7, %p210_p6 }
  0x13   :  { %p213_p9 = pnand %p212_p8, %p206_p5 }
  0x15   :  { %216 = shalt.err (!%p213_p9)
}
  0x16   :  { %s267_s23 = smov 128   ;;  %s268_s24 = smov 8  }
  0x17   :  { %35 = dma.hbm_to_vmem [thread:$0]  %s313_s1, 512, %s30_s18, [#allocation6], %s267_s23, %s267_s23, %s268_s24  }
  0x18   :  { %257 = dma.done.wait [#allocation3], 64  }
  0x19   :  { %258 = vsyncadd [#allocation3], 4294967232 }
  0x1a   :  { %259 = dma.done.wait [#allocation6], 512  }
  0x1b   :  { %260 = vsyncadd [#allocation6], 4294966784  ;;  %v269_v0 = vmov 0   ;;  %v171_v1 = vld [vmem:[#allocation5 + $0x14] ss:$8 sps:$4 sm:$0xff]   ;;  %vm82_vm0 = vcmask 261120   ;;  %v52_v6 = vlaneseq }
  0x1c   :  { %118 = vmatprep.mubr.bf16.mxu0 %v269_v0  ;;  %v173_v2 = vld [vmem:[#allocation5 + $0x10] ss:$8 sps:$4 sm:$0xff]   ;;  %98 = vmatprep.subr.bf16.mxu0 %v171_v1  ;;  %v174_v3 = vld [vmem:[#allocation5 + $0x4] ss:$8 sps:$4 sm:$0xff]   ;;  %v176_v4 = vld [vmem:[#allocation5] ss:$8 sps:$4 sm:$0xff]  }
  0x1d   :  { %99 = vmatpush1.bf16.msra.mxu0 %v173_v2  ;;  %v45_v5 = vld [vmem:[#allocation2] sm:$0xf]  ;;  %v53_v7 = vshrl.u32 %v52_v6, 7  ;;  %s270_s27 = smov [#allocation7]   ;;  %s271_s29 = smov [#allocation8]  }
  0x1e   :  { %100 = vmatprep.subr.bf16.mxu0 %v174_v3  ;;  %v50_v9 = vld [vmem:[%s314_s2] sm:$0x3]  ;;  %s135_s28 = sshll.u32 %s270_s27, 4  ;;  %s145_s30 = sshll.u32 %s271_s29, 4  ;;  %s136_s28 = int_to_ptr.vmem [resolvable:$true] %s135_s28  ;;  %s146_s30 = int_to_ptr.vmem [resolvable:$true] %s145_s30 }
  0x1f   :  { %v54_v8 = vsub.s32 0, %v53_v7  ;;  %v58_v10 = vsub.s32 1, %v53_v7  ;;  %s217_s5 = scalar_lea.vmem %s136_s28, 128  ;;  %p222_p11 = scmp.lt.s32.totalorder %s136_s28, %s136_s28 }
  0x20   :  { %p218_p10 = scmp.ne.s32.totalorder %s136_s28, %s217_s5  ;;  %p223_p12 = scmp.lt.s32.totalorder %s217_s5, %s217_s5 }
  0x21   :  { %101 = vmatpush1.bf16.msra.mxu0 %v176_v4  ;;  %v55_v11 = vrot.slane %v50_v9, %v54_v8  ;;  %v59_v12 = vrot.slane %v50_v9, %v58_v10 }
  0x22   :  { %p224_p13 = por %p223_p12, %p222_p11 }
  0x24   :  { %163 = vmatmul.mubr.msk.bf16.vlgmr.msra.gmra.mxu0 %vm82_vm0, %v45_v5  ;;  %p225_p0 = pnand %p224_p13, %p218_p10 }
  0xe4   :  { %v120_v13 = vpop.f32.mrf.mxu0 }
  0xe5   :  { %v121_v14 = vadd.f32 %v120_v13, %v55_v11 }
  0xe6   :  { %v122_v15 = vpop.f32.mrf.mxu0 }
  0xe7   :  { %127 = vst [vmem:[#allocation7] sm:$0xff] %v121_v14  ;;  %v123_v16 = vadd.f32 %v122_v15, %v59_v12 }
  0xe8   :  { %v124_v17 = vpop.f32.mrf.mxu0 }
  0xe9   :  { %228 = shalt.err (!%p225_p0)
}
  0xea   :  { %138 = dma.vmem_to_hbm [thread:$0]  %s136_s28, 128, %s315_s3, [#allocation4]   ;;  %128 = vst [vmem:[#allocation8] sm:$0xff] %v123_v16  ;;  %v125_v18 = vpop.f32.mrf.mxu0 }
  0xeb   :  { %s237_s7 = scalar_lea.vmem %s146_s30, 128  ;;  %p242_p2 = scmp.lt.s32.totalorder %s146_s30, %s146_s30 }
  0xec   :  { %p238_p1 = scmp.ne.s32.totalorder %s146_s30, %s237_s7  ;;  %p243_p3 = scmp.lt.s32.totalorder %s237_s7, %s237_s7 }
  0xee   :  { %p244_p4 = por %p243_p3, %p242_p2 }
  0xf0   :  { %p245_p5 = pnand %p244_p4, %p238_p1 }
  0xf2   :  { %248 = shalt.err (!%p245_p5)
}
  0xf3   :  { %148 = dma.vmem_to_hbm [thread:$0]  %s146_s30, 128, %s316_s4, [#allocation9]  }
  0xf4   :  { %261 = dma.done.wait [#allocation4], 128  }
  0xf5   :  { %262 = vsyncadd [#allocation4], 4294967168 }
  0xf6   :  { %263 = dma.done.wait [#allocation9], 128  }
  0xf7   :  { %264 = vsyncadd [#allocation9], 4294967168 }
  0xf8   :  { %155 = vsyncpa [#allocation3], 1 }
  0xf9   :  { %156 = vsyncpa [#allocation6], 1 }
  0xfa   :  { %157 = vsyncpa [#allocation4], 1 }
  0xfb   :  { %158 = vsyncpa [#allocation9], 1 }

</bundles_post_ra>
